<compile_context>
chip_gen: v5e
topology: v5e:2x2
jax: 0.10.0
libtpu: 0.0.40
codegen_flags: <defaults>
</compile_context>

<pallas_src>
import functools

import jax
import jax.numpy as jnp
from jax.experimental import pallas as pl
from jax.experimental.pallas import tpu as pltpu


def _round_up(x, m):
    return ((x + m - 1) // m) * m


def _vmem_limit_bytes():
    """Generation-aware VMEM budget (v5e/v6e: 128 MiB, v7x: 64 MiB per TC)."""
    cap = None
    try:
        info = pltpu.get_tpu_info()
        cap = getattr(info, "vmem_capacity_bytes", None)
    except Exception:
        cap = None
    if not cap:
        cap = 64 * 1024 * 1024  # conservative fallback: fits every generation
    # Leave headroom for compiler-internal scratch.
    return max(32 * 1024 * 1024, min(cap - 16 * 1024 * 1024, 110 * 1024 * 1024))


def _working_set_bytes(tm, tn, n_blocks, dim_in, w_it, x_it, o_it):
    w_bufs = 1 if n_blocks == 1 else 2
    return (dim_in * 2 * tn * w_it * w_bufs   # resident weight slab(s)
            + 2 * tm * dim_in * x_it          # double-buffered x tiles
            + 2 * tm * tn * o_it              # double-buffered out tiles
            + tm * 2 * tn * 4                 # f32 matmul result (hg)
            + 2 * 2 * tn * 4)                 # bias (f32)


def _geglu_kernel(x_ref, w_ref, b_ref, o_ref, *, tn, approx_gelu):
    # x_ref: (tm, dim_in)        activation row tile (native dtype)
    # w_ref: (dim_in, 2*tn)      [value | gate] weight slab for this N block
    # b_ref: (1, 2*tn)           [value | gate] bias slab (f32)
    # o_ref: (tm, tn)
    x = x_ref[...]
    w = w_ref[...]

    # One fused matmul per tile (x streamed through the MXU once), f32 acc.
    hg = jnp.dot(x, w, preferred_element_type=jnp.float32)
    hg = hg + b_ref[...]                     # bias already f32

    h = hg[:, :tn]                           # value half (lane-aligned split)
    g = hg[:, tn:]                           # gate half

    if approx_gelu:
        # tanh-approx GELU: transcendental goes to the EUP slot (idle under
        # the MXU).  NOTE: deviates from torch.nn.functional.gelu's exact erf.
        c = jnp.float32(0.7978845608028654)  # sqrt(2/pi)
        gelu_g = 0.5 * g * (1.0 + jnp.tanh(c * (g + 0.044715 * g * g * g)))
    else:
        inv_sqrt2 = jnp.float32(0.7071067811865476)
        gelu_g = 0.5 * g * (1.0 + jax.lax.erf(g * inv_sqrt2))

    o_ref[...] = (h * gelu_g).astype(o_ref.dtype)


def prepare_geglu_params(weight, bias, *, tn=None, tm_hint=512, dtype=None):
    """One-time (model-init) repack of nn.Linear params for the kernel.

    weight: (2*dim_out, dim_in)   bias: (2*dim_out,)
    Returns (w_packed, b_packed, dim_out, tn) where
      w_packed: (dim_in, 2*dim_out_p) with per-N-block [value|gate] layout,
      b_packed: (1, 2*dim_out_p) in f32 (bias kept exact),
      dim_out_p = round_up(dim_out, 128) and tn divides dim_out_p.
    """
    two_dim_out, dim_in = weight.shape
    dim_out = two_dim_out // 2
    if dtype is not None:
        weight = weight.astype(dtype)
    bias = bias.astype(jnp.float32)          # keep bias exact (f32)

    dim_out_p = _round_up(dim_out, 128)
    w_it = jnp.dtype(weight.dtype).itemsize

    if tn is None:
        # Largest tn (divisor of dim_out_p, multiple of 128) fitting VMEM.
        budget = int(0.9 * _vmem_limit_bytes())
        q = dim_out_p // 128
        candidates = sorted({128 * d for d in range(1, q + 1) if q % d == 0},
                            reverse=True)
        tn = candidates[-1]
        for cand in candidates:
            nb = dim_out_p // cand
            if _working_set_bytes(tm_hint, cand, nb, dim_in,
                                  w_it, w_it, w_it) <= budget:
                tn = cand
                break
    else:
        tn = max(128, _round_up(tn, 128))
        while dim_out_p % tn != 0:
            tn -= 128

    n_blocks = dim_out_p // tn

    w_x = weight[:dim_out, :].T              # (dim_in, dim_out)  value half
    w_g = weight[dim_out:, :].T              # (dim_in, dim_out)  gate  half
    b_x = bias[:dim_out]
    b_g = bias[dim_out:]

    pad_n = dim_out_p - dim_out
    if pad_n:
        w_x = jnp.pad(w_x, ((0, 0), (0, pad_n)))
        w_g = jnp.pad(w_g, ((0, 0), (0, pad_n)))
        b_x = jnp.pad(b_x, (0, pad_n))
        b_g = jnp.pad(b_g, (0, pad_n))

    # Interleave per N block: cols [j*2tn, j*2tn+tn) = value_j,
    #                         cols [j*2tn+tn, (j+1)*2tn) = gate_j.
    w_packed = jnp.stack(
        [w_x.reshape(dim_in, n_blocks, tn),
         w_g.reshape(dim_in, n_blocks, tn)], axis=2
    ).reshape(dim_in, 2 * dim_out_p)
    b_packed = jnp.stack(
        [b_x.reshape(n_blocks, tn),
         b_g.reshape(n_blocks, tn)], axis=1
    ).reshape(1, 2 * dim_out_p)

    return w_packed, b_packed, dim_out, tn


@functools.partial(jax.jit,
                   static_argnames=("dim_out", "tn", "tm", "approx_gelu"))
def geglu_forward(x, w_packed, b_packed, *, dim_out, tn, tm=512,
                  approx_gelu=False):
    """x: (B, S, dim_in); w_packed/b_packed from prepare_geglu_params."""
    B, S, dim_in = x.shape
    assert w_packed.shape[0] == dim_in
    dim_out_p = w_packed.shape[1] // 2
    n_blocks = dim_out_p // tn

    M = B * S
    vmem_limit = _vmem_limit_bytes()
    budget = int(0.9 * vmem_limit)

    x_it = jnp.dtype(x.dtype).itemsize
    w_it = jnp.dtype(w_packed.dtype).itemsize

    # Row tile: as large as possible, clamped to problem size & VMEM budget.
    tm_eff = max(8, _round_up(min(tm, _round_up(M, 8)), 8))
    while tm_eff > 8 and _working_set_bytes(
            tm_eff, tn, n_blocks, dim_in, w_it, x_it, x_it) > budget:
        tm_eff = max(8, _round_up(tm_eff // 2, 8))

    m_blocks = pl.cdiv(M, tm_eff)            # partial edge block, no x padding

    x2d = x.reshape(M, dim_in)               # free (contiguous reshape)

    rows = m_blocks * tm_eff
    flops = 2 * rows * dim_in * (2 * dim_out_p)
    transcendentals = rows * dim_out_p
    bytes_accessed = (n_blocks * M * dim_in * x_it        # x re-reads
                      + dim_in * 2 * dim_out_p * w_it     # weights once
                      + 2 * dim_out_p * 4                 # bias
                      + M * dim_out_p * x_it)             # output

    # Weight slab: single-buffered when it is fetched only once (n_blocks==1),
    # double-buffered otherwise so the N-block transition DMA is hidden.
    w_pipeline = pl.Buffered(1) if n_blocks == 1 else pl.Buffered(2)

    out2d = pl.pallas_call(
        functools.partial(_geglu_kernel, tn=tn, approx_gelu=approx_gelu),
        out_shape=jax.ShapeDtypeStruct((M, dim_out_p), x.dtype),
        grid_spec=pltpu.PrefetchScalarGridSpec(
            num_scalar_prefetch=0,
            # N outer, M inner: the weight slab for block j stays resident
            # across the whole inner M sweep.
            grid=(n_blocks, m_blocks),
            in_specs=[
                pl.BlockSpec((tm_eff, dim_in), lambda j, i: (i, 0)),
                pl.BlockSpec((dim_in, 2 * tn), lambda j, i: (0, j),
                             pipeline_mode=w_pipeline),
                pl.BlockSpec((1, 2 * tn), lambda j, i: (0, j)),
            ],
            out_specs=pl.BlockSpec((tm_eff, tn), lambda j, i: (i, j)),
        ),
        compiler_params=pltpu.CompilerParams(
            dimension_semantics=("parallel", "parallel"),
            vmem_limit_bytes=vmem_limit,
        ),
        cost_estimate=pl.CostEstimate(
            flops=flops,
            transcendentals=transcendentals,
            bytes_accessed=bytes_accessed,
        ),
    )(x2d, w_packed, b_packed)

    if dim_out_p != dim_out:                 # only for non-128-multiple dims
        out2d = out2d[:, :dim_out]
    return out2d.reshape(B, S, dim_out)


def geglu_reference(x, weight, bias):
    """Pure-JAX reference of the PyTorch forward (f32 math)."""
    proj = jnp.einsum("bsi,oi->bso", x, weight) + bias
    h, gate = jnp.split(proj, 2, axis=-1)
    return h * jax.nn.gelu(gate, approximate=False)


def _make_params(key, dim_in, dim_out, dtype=jnp.float32):
    k_w, k_b = jax.random.split(key)
    bound = 1.0 / (dim_in ** 0.5)
    weight = jax.random.uniform(k_w, (2 * dim_out, dim_in),
                                minval=-bound, maxval=bound, dtype=dtype)
    bias = jax.random.uniform(k_b, (2 * dim_out,),
                              minval=-bound, maxval=bound, dtype=dtype)
    return weight, bias


if __name__ == "__main__":
    key = jax.random.PRNGKey(0)

    # --- Test 1: aligned small shapes, f32, auto tn ----------------------
    B, S, dim_in, dim_out = 2, 8, 128, 128
    k1, k2, key = jax.random.split(key, 3)
    x = jax.random.normal(k1, (B, S, dim_in), dtype=jnp.float32)
    weight, bias = _make_params(k2, dim_in, dim_out)

    w_p, b_p, d_out, tn = prepare_geglu_params(weight, bias)
    out = geglu_forward(x, w_p, b_p, dim_out=d_out, tn=tn)
    out = jax.block_until_ready(out)
    ref = geglu_reference(x, weight, bias)
    assert out.shape == (B, S, dim_out)
    assert jnp.allclose(out, ref, atol=1e-5, rtol=1e-5), "mismatch (aligned f32)"

    # --- Test 2: ragged shapes (non-128 dim_in/dim_out, M tail block) ----
    B, S, dim_in, dim_out = 2, 7, 40, 200
    k1, k2, key = jax.random.split(key, 3)
    x = jax.random.normal(k1, (B, S, dim_in), dtype=jnp.float32)
    weight, bias = _make_params(k2, dim_in, dim_out)

    w_p, b_p, d_out, tn = prepare_geglu_params(weight, bias)
    out = geglu_forward(x, w_p, b_p, dim_out=d_out, tn=tn)
    out = jax.block_until_ready(out)
    ref = geglu_reference(x, weight, bias)
    assert out.shape == (B, S, dim_out)
    assert jnp.allclose(out, ref, atol=1e-5, rtol=1e-5), "mismatch (ragged f32)"

    # --- Test 3: native bf16 path (bf16 MXU inputs, f32 acc, f32 bias) ---
    B, S, dim_in, dim_out = 2, 8, 128, 128
    k1, k2, key = jax.random.split(key, 3)
    x32 = jax.random.normal(k1, (B, S, dim_in), dtype=jnp.float32)
    weight, bias = _make_params(k2, dim_in, dim_out)

    w_p, b_p, d_out, tn = prepare_geglu_params(weight, bias, dtype=jnp.bfloat16)
    out_bf16 = geglu_forward(x32.astype(jnp.bfloat16), w_p, b_p,
                             dim_out=d_out, tn=tn)
    out_bf16 = jax.block_until_ready(out_bf16)
    ref32 = geglu_reference(x32, weight, bias)
    assert out_bf16.shape == (B, S, dim_out)
    assert bool(jnp.all(jnp.isfinite(out_bf16.astype(jnp.float32))))
    assert jnp.allclose(out_bf16.astype(jnp.float32), ref32,
                        atol=5e-2, rtol=5e-2), "mismatch (bf16)"

    # --- Test 4: multi-block N axis + partial M edge block, f32 ----------
    B, S, dim_in, dim_out = 2, 40, 64, 256
    k1, k2, key = jax.random.split(key, 3)
    x = jax.random.normal(k1, (B, S, dim_in), dtype=jnp.float32)
    weight, bias = _make_params(k2, dim_in, dim_out)

    w_p, b_p, d_out, tn = prepare_geglu_params(weight, bias, tn=128)
    out = geglu_forward(x, w_p, b_p, dim_out=d_out, tn=tn, tm=32)
    out = jax.block_until_ready(out)
    ref = geglu_reference(x, weight, bias)
    assert out.shape == (B, S, dim_out)
    assert jnp.allclose(out, ref, atol=1e-5, rtol=1e-5), "mismatch (multi-block)"

    print("KERNEL_OK")
</pallas_src>

<mosaic_0001>
module attributes {stable_mosaic.version = 11 : i64} {
  func.func @_geglu_kernel(%arg0: i32, %arg1: i32, %arg2: memref<16x128xf32, #tpu.memory_space<vmem>>, %arg3: memref<128x256xf32, #tpu.memory_space<vmem>>, %arg4: memref<1x256xf32, #tpu.memory_space<vmem>>, %arg5: memref<16x128xf32, #tpu.memory_space<vmem>>) attributes {dimension_semantics = [#tpu.dimension_semantics<parallel>, #tpu.dimension_semantics<parallel>], iteration_bounds = array<i64: 1, 1>, scalar_prefetch = 0 : i64, scratch_operands = 0 : i64, tpu.core_type = #tpu.core_type<tc>, window_params = [{transform_indices = @transform_0, window_bounds = array<i64: 16, 128>}, {pipeline_mode = #tpu.pipeline_mode<synchronous>, transform_indices = @transform_1, window_bounds = array<i64: 128, 256>}, {transform_indices = @transform_2, window_bounds = array<i64: 1, 256>}, {transform_indices = @transform_3, window_bounds = array<i64: 16, 128>}]} {
    %c0 = arith.constant 0 : index
    %c0_0 = arith.constant 0 : index
    %0 = vector.load %arg2[%c0, %c0_0] : memref<16x128xf32, #tpu.memory_space<vmem>>, vector<16x128xf32>
    %c0_1 = arith.constant 0 : index
    %c0_2 = arith.constant 0 : index
    %1 = vector.load %arg3[%c0_1, %c0_2] : memref<128x256xf32, #tpu.memory_space<vmem>>, vector<128x256xf32>
    %cst = arith.constant dense<0.000000e+00> : vector<16x256xf32>
    %2 = tpu.matmul %0, %1, %cst {dimension_numbers = #tpu.dot_dimension_numbers<[1], [0], [0], [1], [0, 0, 1, 1], [], []>} : vector<16x128xf32>, vector<128x256xf32>, vector<16x256xf32> -> vector<16x256xf32>
    %c0_3 = arith.constant 0 : index
    %c0_4 = arith.constant 0 : index
    %3 = vector.load %arg4[%c0_3, %c0_4] : memref<1x256xf32, #tpu.memory_space<vmem>>, vector<1x256xf32>
    %4 = vector.broadcast %3 : vector<1x256xf32> to vector<16x256xf32>
    %5 = arith.addf %2, %4 : vector<16x256xf32>
    %6 = vector.extract_strided_slice %5 {offsets = [0, 0], sizes = [16, 128], strides = [1, 1]} : vector<16x256xf32> to vector<16x128xf32>
    %7 = vector.extract_strided_slice %5 {offsets = [0, 128], sizes = [16, 128], strides = [1, 1]} : vector<16x256xf32> to vector<16x128xf32>
    %cst_5 = arith.constant 5.000000e-01 : f32
    %8 = vector.broadcast %cst_5 : f32 to vector<16x128xf32>
    %9 = arith.mulf %8, %7 : vector<16x128xf32>
    %cst_6 = arith.constant 0.707106769 : f32
    %10 = vector.broadcast %cst_6 : f32 to vector<16x128xf32>
    %11 = arith.mulf %7, %10 : vector<16x128xf32>
    %12 = math.erf %11 : vector<16x128xf32>
    %cst_7 = arith.constant 1.000000e+00 : f32
    %13 = vector.broadcast %cst_7 : f32 to vector<16x128xf32>
    %14 = arith.addf %13, %12 : vector<16x128xf32>
    %15 = arith.mulf %9, %14 : vector<16x128xf32>
    %16 = arith.mulf %6, %15 : vector<16x128xf32>
    %c0_8 = arith.constant 0 : index
    %c0_9 = arith.constant 0 : index
    %17 = vector.load %arg5[%c0_8, %c0_9] : memref<16x128xf32, #tpu.memory_space<vmem>>, vector<16x128xf32>
    tpu.vector_store %arg5[%c0_8, %c0_9], %16 {strides = array<i32>} : memref<16x128xf32, #tpu.memory_space<vmem>>, vector<16x128xf32>,
    return
  }
  func.func @transform_0(%arg0: i32, %arg1: i32) -> (i32, i32) {
    %c0_i32 = arith.constant 0 : i32
    %c0_i32_0 = arith.constant 0 : i32
    return %arg1, %c0_i32 : i32, i32
  }
  func.func @transform_1(%arg0: i32, %arg1: i32) -> (i32, i32) {
    %c0_i32 = arith.constant 0 : i32
    %c0_i32_0 = arith.constant 0 : i32
    return %c0_i32, %arg0 : i32, i32
  }
  func.func @transform_2(%arg0: i32, %arg1: i32) -> (i32, i32) {
    %c0_i32 = arith.constant 0 : i32
    %c0_i32_0 = arith.constant 0 : i32
    return %c0_i32, %arg0 : i32, i32
  }
  func.func @transform_3(%arg0: i32, %arg1: i32) -> (i32, i32) {
    %c0_i32 = arith.constant 0 : i32
    return %arg1, %arg0 : i32, i32
  }
}

</mosaic_0001>

<bundles_post_ra>
// kernel: geglu_forward.1
= control target key start
LH: loop header
LB: loop body
LE: loop exit
PB: predicated region body
PF: predicated region fallthrough
CT: control target
= control target key end

     0   :  { %8 = vsyncpa [#allocation3], 0  ;;  %s430_s0 = inlined_call_operand.hbm [shape: f32[16,128], index: 0, kind: input, shape index: {}]   ;;  %s431_s1 = inlined_call_operand.hbm [shape: f32[128,256], index: 1, kind: input, shape index: {}]   ;;  %s432_s2 = inlined_call_operand.vmem [shape: f32[1,256], index: 2, kind: input, shape index: {}]   ;;  %s433_s3 = inlined_call_operand.hbm [shape: f32[16,128], index: 3, kind: output, shape index: {}]  }
   0x1   :  { %9 = vsyncpa [#allocation6], 0 }
   0x2   :  { %10 = vsyncpa [#allocation4], 0  ;;  %s15_s14 = sshll.u32 %s430_s0, 4  ;;  %s368_s15 = smov [#allocation2]   ;;  %s16_s14 = int_to_ptr.hbm [resolvable:$true] %s15_s14 }
   0x3   :  { %s17_s16 = sshll.u32 %s368_s15, 4  ;;  %s28_s19 = sshll.u32 %s431_s1, 4  ;;  %s18_s16 = int_to_ptr.vmem [resolvable:$true] %s17_s16  ;;  %s29_s19 = int_to_ptr.hbm [resolvable:$true] %s28_s19 }
   0x4   :  { %s369_s20 = smov 128   ;;  %s370_s21 = smov 8  }
   0x5   :  { %23 = dma.hbm_to_vmem [thread:$0]  %s16_s14, 256, %s18_s16, [#allocation3], %s369_s20, %s369_s20, %s370_s21  }
   0x6   :  { %s371_s22 = smov [#allocation5]   ;;  %s372_s24 = smov 256  }
   0x7   :  { %s30_s23 = sshll.u32 %s371_s22, 4  ;;  %s373_s0 = smov 16   ;;  %s31_s23 = int_to_ptr.vmem [resolvable:$true] %s30_s23 }
   0x8   :  { %36 = dma.hbm_to_vmem [thread:$0]  %s29_s19, 4096, %s31_s23, [#allocation6], %s372_s24, %s372_s24, %s373_s0  }
   0x9   :  { %362 = dma.done.wait [#allocation3], 256  }
   0xa   :  { %363 = vsyncadd [#allocation3], 4294967040 }
   0xb   :  { %364 = dma.done.wait [#allocation6], 4096  }
   0xc   :  { %365 = vsyncadd [#allocation6], 4294963200  ;;  %v80_v0 = vld [vmem:[#allocation5 + $0xf8] sm:$0xff]  ;;  %v78_v1 = vld [vmem:[#allocation5 + $0xe8] sm:$0xff]  ;;  %s231_s29 = sshll.u32 %s433_s3, 4  ;;  %s232_s29 = int_to_ptr.hbm [resolvable:$true] %s231_s29 }
   0xd   :  { %110 = vmatpush.msra.mxu1 %v80_v0  ;;  %263 = vmatpush.msra.mxu3 %v80_v0  ;;  %v76_v2 = vld [vmem:[#allocation5 + $0xd8] sm:$0xff]  ;;  %v74_v3 = vld [vmem:[#allocation5 + $0xc8] sm:$0xff]  ;;  %v79_v5 = vld [vmem:[#allocation5 + $0xf0] sm:$0xff] }
   0xe   :  { %v72_v4 = vld [vmem:[#allocation5 + $0xb8] sm:$0xff]  ;;  %v77_v6 = vld [vmem:[#allocation5 + $0xe0] sm:$0xff]  ;;  %v70_v7 = vld [vmem:[#allocation5 + $0xa8] sm:$0xff]  ;;  %87 = vmatpush.msra.mxu0 %v79_v5  ;;  %247 = vmatpush.msra.mxu2 %v79_v5 }
   0xf   :  { %111 = vmatpush.msra.mxu1 %v78_v1  ;;  %264 = vmatpush.msra.mxu3 %v78_v1  ;;  %v75_v8 = vld [vmem:[#allocation5 + $0xd0] sm:$0xff]  ;;  %v68_v9 = vld [vmem:[#allocation5 + $0x98] sm:$0xff]  ;;  %v73_v10 = vld [vmem:[#allocation5 + $0xc0] sm:$0xff] }
  0x10   :  { %88 = vmatpush.msra.mxu0 %v77_v6  ;;  %248 = vmatpush.msra.mxu2 %v77_v6  ;;  %v66_v11 = vld [vmem:[#allocation5 + $0x88] sm:$0xff]  ;;  %v71_v12 = vld [vmem:[#allocation5 + $0xb0] sm:$0xff]  ;;  %v64_v13 = vld [vmem:[#allocation5 + $0x78] sm:$0xff] }
  0x11   :  { %112 = vmatpush.msra.mxu1 %v76_v2  ;;  %265 = vmatpush.msra.mxu3 %v76_v2  ;;  %v69_v14 = vld [vmem:[#allocation5 + $0xa0] sm:$0xff]  ;;  %v62_v15 = vld [vmem:[#allocation5 + $0x68] sm:$0xff]  ;;  %v67_v16 = vld [vmem:[#allocation5 + $0x90] sm:$0xff] }
  0x12   :  { %89 = vmatpush.msra.mxu0 %v75_v8  ;;  %249 = vmatpush.msra.mxu2 %v75_v8  ;;  %v60_v17 = vld [vmem:[#allocation5 + $0x58] sm:$0xff]  ;;  %v65_v18 = vld [vmem:[#allocation5 + $0x80] sm:$0xff]  ;;  %v58_v19 = vld [vmem:[#allocation5 + $0x48] sm:$0xff] }
  0x13   :  { %113 = vmatpush.msra.mxu1 %v74_v3  ;;  %266 = vmatpush.msra.mxu3 %v74_v3  ;;  %v63_v20 = vld [vmem:[#allocation5 + $0x70] sm:$0xff]  ;;  %v56_v21 = vld [vmem:[#allocation5 + $0x38] sm:$0xff]  ;;  %v61_v22 = vld [vmem:[#allocation5 + $0x60] sm:$0xff] }
  0x14   :  { %90 = vmatpush.msra.mxu0 %v73_v10  ;;  %250 = vmatpush.msra.mxu2 %v73_v10  ;;  %v54_v23 = vld [vmem:[#allocation5 + $0x28] sm:$0xff]  ;;  %v59_v24 = vld [vmem:[#allocation5 + $0x50] sm:$0xff]  ;;  %v52_v25 = vld [vmem:[#allocation5 + $0x18] sm:$0xff] }
  0x15   :  { %114 = vmatpush.msra.mxu1 %v72_v4  ;;  %267 = vmatpush.msra.mxu3 %v72_v4  ;;  %v57_v26 = vld [vmem:[#allocation5 + $0x40] sm:$0xff]  ;;  %v50_v27 = vld [vmem:[#allocation5 + $0x8] sm:$0xff]  ;;  %v47_v28 = vld [vmem:[#allocation2] sm:$0xff] }
  0x16   :  { %91 = vmatpush.msra.mxu0 %v71_v12  ;;  %251 = vmatpush.msra.mxu2 %v71_v12  ;;  %v48_v29 = vld [vmem:[#allocation2 + $0x8] sm:$0xff]  ;;  %v55_v30 = vld [vmem:[#allocation5 + $0x30] sm:$0xff]  ;;  %v53_v31 = vld [vmem:[#allocation5 + $0x20] sm:$0xff] }
  0x17   :  { %115 = vmatpush.msra.mxu1 %v70_v7  ;;  %268 = vmatpush.msra.mxu3 %v70_v7  ;;  %v51_v32 = vld [vmem:[#allocation5 + $0x10] sm:$0xff]  ;;  %v49_v33 = vld [vmem:[#allocation5] sm:$0xff] }
  0x18   :  { %92 = vmatpush.msra.mxu0 %v69_v14  ;;  %252 = vmatpush.msra.mxu2 %v69_v14  ;;  %v407_v34 = vld [vmem:[%s432_s2] sm:$0x3]  ;;  %s374_s2 = smov [#allocation7]  }
  0x19   :  { %116 = vmatpush.msra.mxu1 %v68_v9  ;;  %269 = vmatpush.msra.mxu3 %v68_v9  ;;  %v84_v35 = vperm.slane %v407_v34, 1  ;;  %s229_s26 = sshll.u32 %s374_s2, 4  ;;  %s230_s26 = int_to_ptr.vmem [resolvable:$true] %s229_s26 }
  0x1a   :  { %93 = vmatpush.msra.mxu0 %v67_v16  ;;  %253 = vmatpush.msra.mxu2 %v67_v16 }
  0x1b   :  { %117 = vmatpush.msra.mxu1 %v66_v11  ;;  %270 = vmatpush.msra.mxu3 %v66_v11 }
  0x1c   :  { %94 = vmatpush.msra.mxu0 %v65_v18  ;;  %254 = vmatpush.msra.mxu2 %v65_v18 }
  0x1d   :  { %118 = vmatpush.msra.mxu1 %v64_v13  ;;  %271 = vmatpush.msra.mxu3 %v64_v13 }
  0x1e   :  { %95 = vmatpush.msra.mxu0 %v63_v20  ;;  %255 = vmatpush.msra.mxu2 %v63_v20 }
  0x1f   :  { %119 = vmatpush.msra.mxu1 %v62_v15  ;;  %272 = vmatpush.msra.mxu3 %v62_v15 }
  0x20   :  { %96 = vmatpush.msra.mxu0 %v61_v22  ;;  %256 = vmatpush.msra.mxu2 %v61_v22 }
  0x21   :  { %120 = vmatpush.msra.mxu1 %v60_v17  ;;  %273 = vmatpush.msra.mxu3 %v60_v17 }
  0x22   :  { %97 = vmatpush.msra.mxu0 %v59_v24  ;;  %257 = vmatpush.msra.mxu2 %v59_v24 }
  0x23   :  { %121 = vmatpush.msra.mxu1 %v58_v19  ;;  %274 = vmatpush.msra.mxu3 %v58_v19 }
  0x24   :  { %98 = vmatpush.msra.mxu0 %v57_v26  ;;  %258 = vmatpush.msra.mxu2 %v57_v26 }
  0x25   :  { %122 = vmatpush.msra.mxu1 %v56_v21  ;;  %275 = vmatpush.msra.mxu3 %v56_v21 }
  0x26   :  { %99 = vmatpush.msra.mxu0 %v55_v30  ;;  %259 = vmatpush.msra.mxu2 %v55_v30 }
  0x27   :  { %123 = vmatpush.msra.mxu1 %v54_v23  ;;  %276 = vmatpush.msra.mxu3 %v54_v23 }
  0x28   :  { %100 = vmatpush.msra.mxu0 %v53_v31  ;;  %260 = vmatpush.msra.mxu2 %v53_v31 }
  0x29   :  { %124 = vmatpush.msra.mxu1 %v52_v25  ;;  %277 = vmatpush.msra.mxu3 %v52_v25 }
  0x2a   :  { %101 = vmatpush.msra.mxu0 %v51_v32  ;;  %261 = vmatpush.msra.mxu2 %v51_v32 }
  0x2b   :  { %125 = vmatpush.msra.mxu1 %v50_v27  ;;  %278 = vmatpush.msra.mxu3 %v50_v27 }
  0x2c   :  { %126 = vmatmul.f32.vlgmr.msra.gmra.mxu1 %v47_v28  ;;  %129 = vmatmul.f32.vlgmr.msra.gmra.mxu3 %v48_v29 }
  0x2d   :  { %102 = vmatpush.msra.mxu0 %v49_v33  ;;  %262 = vmatpush.msra.mxu2 %v49_v33 }
  0x2e   :  { %103 = vmatmul.f32.vlgmr.msra.gmra.mxu0 %v47_v28  ;;  %106 = vmatmul.f32.vlgmr.msra.gmra.mxu2 %v48_v29 }
  0xa9   :  { %v127_v36 = vpop.f32.mrf.mxu1 }
  0xaa   :  { %v410_v37 = vadd.f32 %v127_v36, %v84_v35 }
  0xac   :  { %v135_v38 = vmul.f32 0.70710677, %v410_v37 }
  0xae   :  { %v137_v39 = vmul.f32 %v135_v38, %v135_v38 }
  0xaf   :  { %v130_v40 = vpop.f32.mrf.mxu3 }
  0xb0   :  { %v138_v41 = vmin.f32 %v137_v39, 16.0  ;;  %v413_v42 = vadd.f32 %v130_v40, %v84_v35  ;;  %v83_v40 = vperm.slane %v407_v34, 0 }
  0xb2   :  { %v139_v43 = vmul.f32 2.1237322e-06, %v138_v41  ;;  %v150_v44 = vmul.f32 3.8918573e-05, %v138_v41  ;;  %v416_v45 = vmul.f32 0.70710677, %v413_v42 }
  0xb4   :  { %v140_v46 = vadd.f32 0.00028619796, %v139_v43  ;;  %v151_v47 = vadd.f32 0.001143296, %v150_v44  ;;  %v177_v48 = vmul.f32 %v416_v45, %v416_v45 }
  0xb6   :  { %v141_v49 = vmul.f32 %v140_v46, %v138_v41  ;;  %v152_v50 = vmul.f32 %v151_v47, %v138_v41  ;;  %v178_v51 = vmin.f32 %v177_v48, 16.0  ;;  %v104_v46 = vpop.f32.mrf.mxu0 }
  0xb8   :  { %v153_v52 = vadd.f32 0.014752088, %v152_v50  ;;  %v142_v53 = vadd.f32 0.0036580483, %v141_v49  ;;  %v179_v54 = vmul.f32 2.1237322e-06, %v178_v51  ;;  %v105_v50 = vadd.f32 %v104_v46, %v83_v40 }
  0xb9   :  { %v190_v55 = vmul.f32 3.8918573e-05, %v178_v51  ;;  %v133_v49 = vmul.f32 0.5, %v410_v37 }
  0xba   :  { %v154_v56 = vmul.f32 %v153_v52, %v138_v41  ;;  %v180_v57 = vadd.f32 0.00028619796, %v179_v54  ;;  %v143_v60 = vmul.f32 %v142_v53, %v138_v41 }
  0xbb   :  { %v191_v58 = vadd.f32 0.001143296, %v190_v55 }
  0xbc   :  { %v155_v59 = vadd.f32 0.112945676, %v154_v56  ;;  %v181_v61 = vmul.f32 %v180_v57, %v178_v51  ;;  %v144_v3 = vadd.f32 0.05243302, %v143_v60  ;;  %v107_v57 = vpop.f32.mrf.mxu2 }
  0xbd   :  { %v192_v62 = vmul.f32 %v191_v58, %v178_v51  ;;  %v108_v60 = vadd.f32 %v107_v57, %v83_v40 }
  0xbe   :  { %v156_v63 = vmul.f32 %v155_v59, %v138_v41  ;;  %v182_v2 = vadd.f32 0.0036580483, %v181_v61  ;;  %v145_v9 = vmul.f32 %v144_v3, %v138_v41  ;;  %v134_v59 = vmul.f32 0.5, %v413_v42 }
  0xbf   :  { %v193_v0 = vadd.f32 0.014752088, %v192_v62 }
  0xc0   :  { %v157_v1 = vadd.f32 0.4994258, %v156_v63  ;;  %v183_v8 = vmul.f32 %v182_v2, %v178_v51  ;;  %v146_v13 = vadd.f32 0.18741608, %v145_v9 }
  0xc1   :  { %v194_v4 = vmul.f32 %v193_v0, %v178_v51 }
  0xc2   :  { %v158_v5 = vmul.f32 %v157_v1, %v138_v41  ;;  %v184_v12 = vadd.f32 0.05243302, %v183_v8  ;;  %v147_v18 = vmul.f32 %v146_v13, %v138_v41 }
  0xc3   :  { %v195_v6 = vadd.f32 0.112945676, %v194_v4 }
  0xc4   :  { %v159_v7 = vadd.f32 1.0, %v158_v5  ;;  %v185_v17 = vmul.f32 %v184_v12, %v178_v51  ;;  %v148_v23 = vadd.f32 1.1283791, %v147_v18 }
  0xc5   :  { %v196_v10 = vmul.f32 %v195_v6, %v178_v51 }
  0xc6   :  { %286 = vrcp.f32 %v159_v7  ;;  %v171_v21 = vand.u32 2147483648, %v159_v7  ;;  %v186_v22 = vadd.f32 0.18741608, %v185_v17  ;;  %v169_v25 = vand.u32 2147483647, %v159_v7 }
  0xc7   :  { %v197_v11 = vadd.f32 0.4994258, %v196_v10  ;;  %vm165_vm1 = vweird.f32 %v159_v7  ;;  %v149_v31 = vmul.f32 %v148_v23, %v135_v38 }
  0xc8   :  { %v172_v28 = vor.u32 1.1754944e-38, %v171_v21  ;;  %v187_v29 = vmul.f32 %v186_v22, %v178_v51  ;;  %vm170_vm3 = vcmp.eq.f32.partialorder %v169_v25, 8.507059e+37 }
  0xc9   :  { %v198_v14 = vmul.f32 %v197_v11, %v178_v51 }
  0xca   :  { %v188_v41 = vadd.f32 1.1283791, %v187_v29 }
  0xcb   :  { %v199_v15 = vadd.f32 1.0, %v198_v14 }
  0xcc   :  { %v287_v16 = vpop.eup %286  ;;  %v189_v52 = vmul.f32 %v188_v41, %v416_v45 }
  0xcd   :  { %v161_v19 = vmul.f32 %v287_v16, %v159_v7  ;;  %288 = vrcp.f32 %v199_v15  ;;  %vm166_vm0 = vweird.f32 %v287_v16  ;;  %v211_v39 = vand.u32 2147483648, %v199_v15 }
  0xce   :  { %vm167_vm2 = vmor %vm165_vm1, %vm166_vm0  ;;  %v209_v44 = vand.u32 2147483647, %v199_v15  ;;  %vm205_vm5 = vweird.f32 %v199_v15 }
  0xcf   :  { %v162_v20 = vsub.f32 1.0, %v161_v19  ;;  %v212_v38 = vor.u32 1.1754944e-38, %v211_v39 }
  0xd0   :  { %vm210_vm7 = vcmp.eq.f32.partialorder %v209_v44, 8.507059e+37 }
  0xd1   :  { %v163_v24 = vmul.f32 %v287_v16, %v162_v20 }
  0xd3   :  { %v289_v26 = vpop.eup %288  ;;  %v164_v27 = vadd.f32 %v287_v16, %v163_v24 }
  0xd4   :  { %v201_v30 = vmul.f32 %v289_v26, %v199_v15  ;;  %vm206_vm4 = vweird.f32 %v289_v26 }
  0xd5   :  { %v168_v32 = vsel %vm167_vm2, %v287_v16, %v164_v27  ;;  %vm207_vm6 = vmor %vm205_vm5, %vm206_vm4 }
  0xd6   :  { %v173_v33 = vsel %vm170_vm3, %v172_v28, %v168_v32  ;;  %v202_v35 = vsub.f32 1.0, %v201_v30 }
  0xd7   :  { %v174_v36 = vmul.f32 %v173_v33, %v149_v31 }
  0xd8   :  { %v203_v43 = vmul.f32 %v289_v26, %v202_v35 }
  0xd9   :  { %v245_v47 = vclamps-f32 %v174_v36, 1.0 }
  0xda   :  { %v204_v48 = vadd.f32 %v289_v26, %v203_v43 }
  0xdb   :  { %v217_v51 = vadd.f32 1.0, %v245_v47 }
  0xdc   :  { %v208_v53 = vsel %vm207_vm6, %v289_v26, %v204_v48 }
  0xdd   :  { %v213_v54 = vsel %vm210_vm7, %v212_v38, %v208_v53  ;;  %v219_v34 = vmul.f32 %v217_v51, %v133_v49 }
  0xde   :  { %v214_v55 = vmul.f32 %v213_v54, %v189_v52 }
  0xdf   :  { %v221_v56 = vmul.f32 %v219_v34, %v105_v50 }
  0xe0   :  { %v246_v58 = vclamps-f32 %v214_v55, 1.0 }
  0xe1   :  { %223 = vst [vmem:[#allocation7] sm:$0xff] %v221_v56 }
  0xe2   :  { %v218_v61 = vadd.f32 1.0, %v246_v58 }
  0xe4   :  { %v220_v37 = vmul.f32 %v218_v61, %v134_v59 }
  0xe6   :  { %v222_v45 = vmul.f32 %v220_v37, %v108_v60 }
  0xe8   :  { %224 = vst [vmem:[#allocation7 + $0x8] sm:$0xff] %v222_v45 }
  0xe9   :  { %237 = dma.vmem_to_hbm [thread:$0]  %s230_s26, 256, %s232_s29, [#allocation4], %s369_s20, %s369_s20, %s370_s21  }
  0xea   :  { %366 = dma.done.wait [#allocation4], 256  }
  0xeb   :  { %367 = vsyncadd [#allocation4], 4294967040 }
  0xec   :  { %242 = vsyncpa [#allocation3], 1 }
  0xed   :  { %243 = vsyncpa [#allocation6], 1 }
  0xee   :  { %244 = vsyncpa [#allocation4], 1 }

</bundles_post_ra>
